<compile_context>
chip_gen: v6e
topology: v6e:2x2x1
jax: 0.10.0
libtpu: 0.0.40
codegen_flags: <defaults>
</compile_context>

<pallas_src>
import functools

import jax
import jax.numpy as jnp
from jax import lax
from jax.experimental import pallas as pl
from jax.experimental.pallas import tpu as pltpu

NEG_SLOPE = 0.01   # PyTorch LeakyReLU default
LANE = 128         # TPU lane width


def _leaky_relu(x):
    # For 0 < slope < 1:  LeakyReLU(x) == max(x, slope * x)  (mul + max).
    return jnp.maximum(x, NEG_SLOPE * x)


def mlp_kernel(xt_ref, w1_ref, b1_ref, w2_ref, w3_ref, w4_ref, o_ref, *, chunk):
    # xt tile: (in, tm) with batch on lanes.
    # w1: (H+1, in) (last row zeros), b1: (H+1, 1) (last row 1)  -> h1 last row == 1
    # w2, w3: (H+1, H+1) with bias in last column, bottom row = e_last
    # w4: (out, H+1) with bias in last column.
    w1 = w1_ref[...]
    b1 = b1_ref[...]
    w2 = w2_ref[...]
    w3 = w3_ref[...]
    w4 = w4_ref[...]

    tm = xt_ref.shape[-1]
    n_chunks = tm // chunk

    def body(c, carry):
        start = pl.multiple_of(c * chunk, chunk)
        xt = xt_ref[:, pl.ds(start, chunk)]                         # (in, chunk)

        if w1.shape[1] == 1:
            # K=1 contraction is a rank-1 outer product: VPU broadcast mul,
            # no MXU round-trip.
            h = w1 * xt
        else:
            h = jnp.dot(w1, xt, preferred_element_type=jnp.float32)
        h = _leaky_relu(h + b1)                                      # (H+1, chunk), last row == 1

        # Hidden layers: bias folded into the last column of the weight; the
        # constant ones row is regenerated by the e_last bottom row of W.
        h = _leaky_relu(jnp.dot(w2, h, preferred_element_type=jnp.float32))
        h = _leaky_relu(jnp.dot(w3, h, preferred_element_type=jnp.float32))

        # Final layer: (out, H+1) @ (H+1, chunk); 1-row result is lane-dense.
        out = jnp.dot(w4, h, preferred_element_type=jnp.float32)
        o_ref[:, pl.ds(start, chunk)] = out.astype(o_ref.dtype)
        return carry

    lax.fori_loop(0, n_chunks, body, 0, unroll=True)


def _augment_params(params):
    """Fold biases into the weights (homogeneous-coordinate trick)."""
    w1, b1 = params["w1"], params["b1"]          # (H, in), (H, 1)
    w2, b2 = params["w2"], params["b2"]          # (H, H),  (H, 1)
    w3, b3 = params["w3"], params["b3"]
    w4, b4 = params["w4"], params["b4"]          # (out, H), (out, 1)
    H = w2.shape[0]

    w1a = jnp.concatenate([w1, jnp.zeros((1, w1.shape[1]), w1.dtype)], axis=0)   # (H+1, in)
    b1a = jnp.concatenate([b1, jnp.ones((1, 1), b1.dtype)], axis=0)              # (H+1, 1)

    def aug_hidden(w, b):
        top = jnp.concatenate([w, b], axis=1)                                    # (H, H+1)
        bottom = jnp.zeros((1, H + 1), w.dtype).at[0, H].set(1.0)                # e_last
        return jnp.concatenate([top, bottom], axis=0)                            # (H+1, H+1)

    w2a = aug_hidden(w2, b2)
    w3a = aug_hidden(w3, b3)
    w4a = jnp.concatenate([w4, b4], axis=1)                                      # (out, H+1)
    return w1a, b1a, w2a, w3a, w4a


def neural_net_forward(x, params, *, tm_max=4096, chunk_max=512):
    """Forward pass of the PINN MLP.

    x: (N, input_size) float32.
    params: dict with PyTorch-layout weights  w* : (out, in),  b* : (out, 1).
    Returns (N, output_size) float32.
    """
    N, in_size = x.shape
    H = params["w2"].shape[0]
    out_size = params["w4"].shape[0]
    assert params["w1"].shape == (H, in_size)
    assert params["w4"].shape == (out_size, H)

    w1a, b1a, w2a, w3a, w4a = _augment_params(params)

    # --- Tiling: lane-rounded batch, >=2 grid steps (v7x megacore) when the
    # batch allows it, tm chosen to nearly divide so padding waste <= ~127.
    n_lane = pl.cdiv(N, LANE) * LANE
    min_steps = 2 if n_lane >= 2 * LANE else 1
    steps = max(min_steps, pl.cdiv(n_lane, tm_max))
    tm = pl.cdiv(pl.cdiv(n_lane, steps), LANE) * LANE
    steps = pl.cdiv(n_lane, tm)
    n_pad = steps * tm

    # Largest power-of-two chunk (>=128) that divides the tile.
    chunk = chunk_max
    while tm % chunk:
        chunk //= 2
    chunk = max(chunk, LANE)

    # Transposed (batch-on-lanes) input, zero-padded to the tile multiple.
    xt = x.T
    if n_pad != N:
        xt = jnp.pad(xt, ((0, 0), (0, n_pad - N)))

    def const_spec(shape):
        # Small parameter array, VMEM-resident, same block every grid step.
        return pl.BlockSpec(shape, lambda i: (0, 0))

    out_t = pl.pallas_call(
        functools.partial(mlp_kernel, chunk=chunk),
        out_shape=jax.ShapeDtypeStruct((out_size, n_pad), jnp.float32),
        grid_spec=pltpu.PrefetchScalarGridSpec(
            num_scalar_prefetch=0,
            grid=(steps,),
            in_specs=[
                pl.BlockSpec((in_size, tm), lambda i: (0, i)),    # x^T tile
                const_spec(w1a.shape), const_spec(b1a.shape),
                const_spec(w2a.shape), const_spec(w3a.shape),
                const_spec(w4a.shape),
            ],
            out_specs=pl.BlockSpec((out_size, tm), lambda i: (0, i)),
        ),
        compiler_params=pltpu.CompilerParams(
            dimension_semantics=("parallel",)),
    )(xt, w1a, b1a, w2a, w3a, w4a)

    # (out_size, n_pad) -> (N, out_size)
    return out_t[:, :N].T


def init_params(key, input_size=1, hidden_size=32, output_size=1):
    """nn.Linear-style init: U(-1/sqrt(fan_in), 1/sqrt(fan_in)).

    Weights in PyTorch layout (out_features, in_features); biases (out, 1)."""
    def linear(key, fan_in, fan_out):
        kw, kb = jax.random.split(key)
        bound = 1.0 / jnp.sqrt(fan_in)
        w = jax.random.uniform(kw, (fan_out, fan_in), jnp.float32, -bound, bound)
        b = jax.random.uniform(kb, (fan_out, 1), jnp.float32, -bound, bound)
        return w, b

    k1, k2, k3, k4 = jax.random.split(key, 4)
    w1, b1 = linear(k1, input_size, hidden_size)
    w2, b2 = linear(k2, hidden_size, hidden_size)
    w3, b3 = linear(k3, hidden_size, hidden_size)
    w4, b4 = linear(k4, hidden_size, output_size)
    return dict(w1=w1, b1=b1, w2=w2, b2=b2, w3=w3, b3=b3, w4=w4, b4=b4)


def reference_forward(x, p):
    """Pure-JAX reference matching the PyTorch module (un-augmented params)."""
    h = _leaky_relu(x @ p["w1"].T + p["b1"].T)
    h = _leaky_relu(h @ p["w2"].T + p["b2"].T)
    h = _leaky_relu(h @ p["w3"].T + p["b3"].T)
    return h @ p["w4"].T + p["b4"].T


if __name__ == "__main__":
    key = jax.random.PRNGKey(0)
    kx, kp = jax.random.split(key)

    hidden_size = 32
    input_size = 1
    output_size = 1

    params = init_params(kp, input_size, hidden_size, output_size)

    # Case 1: single lane-group batch (grid=(1,), one inner chunk).
    N = 128
    x = jax.random.uniform(kx, (N, input_size), jnp.float32, -1.0, 1.0)
    out = jax.block_until_ready(neural_net_forward(x, params))
    ref = reference_forward(x, params)
    assert out.shape == (N, output_size)
    assert jnp.allclose(out, ref, atol=1e-4, rtol=1e-4), "mismatch vs reference (N=128)"

    # Case 2: ragged batch size (zero padding + 2 grid steps).
    N2 = 200
    x2 = jax.random.uniform(jax.random.PRNGKey(7), (N2, input_size),
                            jnp.float32, -1.0, 1.0)
    out2 = jax.block_until_ready(neural_net_forward(x2, params))
    ref2 = reference_forward(x2, params)
    assert out2.shape == (N2, output_size)
    assert jnp.allclose(out2, ref2, atol=1e-4, rtol=1e-4), "mismatch vs reference (N=200)"

    # Case 3: larger batch exercising multi-step grid + inner chunk loop.
    N3 = 2048
    x3 = jax.random.uniform(jax.random.PRNGKey(11), (N3, input_size),
                            jnp.float32, -1.0, 1.0)
    out3 = jax.block_until_ready(neural_net_forward(x3, params))
    ref3 = reference_forward(x3, params)
    assert out3.shape == (N3, output_size)
    assert jnp.allclose(out3, ref3, atol=1e-4, rtol=1e-4), "mismatch vs reference (N=2048)"

    print("KERNEL_OK")
</pallas_src>

<mosaic_0001>
module attributes {stable_mosaic.version = 11 : i64} {
  func.func @mlp_kernel(%arg0: i32, %arg1: memref<1x128xf32, #tpu.memory_space<vmem>>, %arg2: memref<33x1xf32, #tpu.memory_space<vmem>>, %arg3: memref<33x1xf32, #tpu.memory_space<vmem>>, %arg4: memref<33x33xf32, #tpu.memory_space<vmem>>, %arg5: memref<33x33xf32, #tpu.memory_space<vmem>>, %arg6: memref<1x33xf32, #tpu.memory_space<vmem>>, %arg7: memref<1x128xf32, #tpu.memory_space<vmem>>) attributes {dimension_semantics = [#tpu.dimension_semantics<parallel>], iteration_bounds = array<i64: 1>, scalar_prefetch = 0 : i64, scratch_operands = 0 : i64, tpu.core_type = #tpu.core_type<tc>, window_params = [{transform_indices = @transform_0, window_bounds = array<i64: 1, 128>}, {pipeline_mode = #tpu.pipeline_mode<synchronous>, transform_indices = @transform_1, window_bounds = array<i64: 33, 1>}, {pipeline_mode = #tpu.pipeline_mode<synchronous>, transform_indices = @transform_2, window_bounds = array<i64: 33, 1>}, {pipeline_mode = #tpu.pipeline_mode<synchronous>, transform_indices = @transform_3, window_bounds = array<i64: 33, 33>}, {pipeline_mode = #tpu.pipeline_mode<synchronous>, transform_indices = @transform_4, window_bounds = array<i64: 33, 33>}, {pipeline_mode = #tpu.pipeline_mode<synchronous>, transform_indices = @transform_5, window_bounds = array<i64: 1, 33>}, {transform_indices = @transform_6, window_bounds = array<i64: 1, 128>}]} {
    %c0 = arith.constant 0 : index
    %c0_0 = arith.constant 0 : index
    %0 = vector.load %arg2[%c0, %c0_0] : memref<33x1xf32, #tpu.memory_space<vmem>>, vector<33x1xf32>
    %c0_1 = arith.constant 0 : index
    %c0_2 = arith.constant 0 : index
    %1 = vector.load %arg3[%c0_1, %c0_2] : memref<33x1xf32, #tpu.memory_space<vmem>>, vector<33x1xf32>
    %c0_3 = arith.constant 0 : index
    %c0_4 = arith.constant 0 : index
    %2 = vector.load %arg4[%c0_3, %c0_4] : memref<33x33xf32, #tpu.memory_space<vmem>>, vector<33x33xf32>
    %c0_5 = arith.constant 0 : index
    %c0_6 = arith.constant 0 : index
    %3 = vector.load %arg5[%c0_5, %c0_6] : memref<33x33xf32, #tpu.memory_space<vmem>>, vector<33x33xf32>
    %c0_7 = arith.constant 0 : index
    %c0_8 = arith.constant 0 : index
    %4 = vector.load %arg6[%c0_7, %c0_8] : memref<1x33xf32, #tpu.memory_space<vmem>>, vector<1x33xf32>
    %c0_i32 = arith.constant 0 : i32
    %c128_i32 = arith.constant 128 : i32
    %5 = arith.muli %c0_i32, %c128_i32 : i32
    %6 = tpu.assume_multiple %5, 128 : i32
    %c0_9 = arith.constant 0 : index
    %7 = arith.index_cast %6 : i32 to index
    %8 = vector.load %arg1[%c0_9, %7] : memref<1x128xf32, #tpu.memory_space<vmem>>, vector<1x128xf32>
    %9 = vector.broadcast %0 : vector<33x1xf32> to vector<33x128xf32>
    %10 = vector.broadcast %8 : vector<1x128xf32> to vector<33x128xf32>
    %11 = arith.mulf %9, %10 : vector<33x128xf32>
    %12 = vector.broadcast %1 : vector<33x1xf32> to vector<33x128xf32>
    %13 = arith.addf %11, %12 : vector<33x128xf32>
    %cst = arith.constant 0.00999999977 : f32
    %14 = vector.broadcast %cst : f32 to vector<33x128xf32>
    %15 = arith.mulf %14, %13 : vector<33x128xf32>
    %16 = arith.maximumf %13, %15 : vector<33x128xf32>
    %cst_10 = arith.constant dense<0.000000e+00> : vector<33x128xf32>
    %17 = tpu.matmul %2, %16, %cst_10 {dimension_numbers = #tpu.dot_dimension_numbers<[1], [0], [0], [1], [0, 0, 1, 1], [], []>} : vector<33x33xf32>, vector<33x128xf32>, vector<33x128xf32> -> vector<33x128xf32>
    %cst_11 = arith.constant 0.00999999977 : f32
    %18 = vector.broadcast %cst_11 : f32 to vector<33x128xf32>
    %19 = arith.mulf %18, %17 : vector<33x128xf32>
    %20 = arith.maximumf %17, %19 : vector<33x128xf32>
    %cst_12 = arith.constant dense<0.000000e+00> : vector<33x128xf32>
    %21 = tpu.matmul %3, %20, %cst_12 {dimension_numbers = #tpu.dot_dimension_numbers<[1], [0], [0], [1], [0, 0, 1, 1], [], []>} : vector<33x33xf32>, vector<33x128xf32>, vector<33x128xf32> -> vector<33x128xf32>
    %cst_13 = arith.constant 0.00999999977 : f32
    %22 = vector.broadcast %cst_13 : f32 to vector<33x128xf32>
    %23 = arith.mulf %22, %21 : vector<33x128xf32>
    %24 = arith.maximumf %21, %23 : vector<33x128xf32>
    %cst_14 = arith.constant dense<0.000000e+00> : vector<1x128xf32>
    %25 = tpu.matmul %4, %24, %cst_14 {dimension_numbers = #tpu.dot_dimension_numbers<[1], [0], [0], [1], [0, 0, 1, 1], [], []>} : vector<1x33xf32>, vector<33x128xf32>, vector<1x128xf32> -> vector<1x128xf32>
    %c0_15 = arith.constant 0 : index
    %26 = arith.index_cast %6 : i32 to index
    %27 = vector.load %arg7[%c0_15, %26] : memref<1x128xf32, #tpu.memory_space<vmem>>, vector<1x128xf32>
    tpu.vector_store %arg7[%c0_15, %26], %25 {strides = array<i32>} : memref<1x128xf32, #tpu.memory_space<vmem>>, vector<1x128xf32>,
    %c1_i32 = arith.constant 1 : i32
    return
  }
  func.func @transform_0(%arg0: i32) -> (i32, i32) {
    %c0_i32 = arith.constant 0 : i32
    %c0_i32_0 = arith.constant 0 : i32
    return %c0_i32, %arg0 : i32, i32
  }
  func.func @transform_1(%arg0: i32) -> (i32, i32) {
    %c0_i32 = arith.constant 0 : i32
    %c0_i32_0 = arith.constant 0 : i32
    %c0_i32_1 = arith.constant 0 : i32
    return %c0_i32, %c0_i32_0 : i32, i32
  }
  func.func @transform_2(%arg0: i32) -> (i32, i32) {
    %c0_i32 = arith.constant 0 : i32
    %c0_i32_0 = arith.constant 0 : i32
    %c0_i32_1 = arith.constant 0 : i32
    return %c0_i32, %c0_i32_0 : i32, i32
  }
  func.func @transform_3(%arg0: i32) -> (i32, i32) {
    %c0_i32 = arith.constant 0 : i32
    %c0_i32_0 = arith.constant 0 : i32
    %c0_i32_1 = arith.constant 0 : i32
    return %c0_i32, %c0_i32_0 : i32, i32
  }
  func.func @transform_4(%arg0: i32) -> (i32, i32) {
    %c0_i32 = arith.constant 0 : i32
    %c0_i32_0 = arith.constant 0 : i32
    %c0_i32_1 = arith.constant 0 : i32
    return %c0_i32, %c0_i32_0 : i32, i32
  }
  func.func @transform_5(%arg0: i32) -> (i32, i32) {
    %c0_i32 = arith.constant 0 : i32
    %c0_i32_0 = arith.constant 0 : i32
    %c0_i32_1 = arith.constant 0 : i32
    return %c0_i32, %c0_i32_0 : i32, i32
  }
  func.func @transform_6(%arg0: i32) -> (i32, i32) {
    %c0_i32 = arith.constant 0 : i32
    %c0_i32_0 = arith.constant 0 : i32
    return %c0_i32, %arg0 : i32, i32
  }
}

</mosaic_0001>

<bundles_post_ra>
// kernel: tpu_custom_call.1
= control target key start
LH: loop header
LB: loop body
LE: loop exit
PB: predicated region body
PF: predicated region fallthrough
CT: control target
= control target key end

     0   :  { %v583_v2 = vmov 0   ;;  %v584_v5 = vmov 0.0   ;;  %s742_s0 = inlined_call_operand.vmem [shape: f32[1,128], index: 0, kind: input, shape index: {}]   ;;  %s743_s1 = inlined_call_operand.vmem [shape: f32[33,1], index: 1, kind: input, shape index: {}]   ;;  %s744_s2 = inlined_call_operand.vmem [shape: f32[33,1], index: 2, kind: input, shape index: {}]   ;;  %s745_s3 = inlined_call_operand.vmem [shape: f32[33,33], index: 3, kind: input, shape index: {}]   ;;  %s746_s4 = inlined_call_operand.vmem [shape: f32[33,33], index: 4, kind: input, shape index: {}]   ;;  %s747_s5 = inlined_call_operand.vmem [shape: f32[1,33], index: 5, kind: input, shape index: {}]   ;;  %s748_s6 = inlined_call_operand.hbm [shape: f32[1,128], index: 6, kind: output, shape index: {}]  }
   0x1   :  { %v33_v0 = vld [vmem:[%s744_s2 + $0x20] sm:$0x1]  ;;  %560 = vset.pattern.permute.xlu1 %v583_v2  ;;  %559 = vset.pattern.permute.xlu0 %v583_v2  ;;  %v27_v3 = vld [vmem:[%s743_s1 + $0x18] sm:$0xff]  ;;  %v26_v4 = vld [vmem:[%s743_s1 + $0x10] sm:$0xff] }
   0x2   :  { %v28_v1 = vld [vmem:[%s743_s1 + $0x20] sm:$0x1]  ;;  %104 = vperm.xlu1 %560, %v33_v0   ;;  %492 = vmatprep.subr.mxu0 %v584_v5 }
   0x3   :  { %68 = vperm.xlu0 %559, %v28_v1   ;;  %517 = vmatprep.subr.mxu1 %v584_v5 }
   0x4   :  { %11 = vsyncpa [#allocation3], 0  ;;  %v32_v6 = vld [vmem:[%s744_s2 + $0x18] sm:$0xff]  ;;  %v25_v7 = vld [vmem:[%s743_s1 + $0x8] sm:$0xff]  ;;  %vm585_vm0 = vmmov 0   ;;  %vm138_vm1 = vcmask 1040384  }
   0x5   :  { %v31_v8 = vld [vmem:[%s744_s2 + $0x10] sm:$0xff]  ;;  %v24_v9 = vld [vmem:[%s743_s1] sm:$0xff]  ;;  %v30_v10 = vld [vmem:[%s744_s2 + $0x8] sm:$0xff]  ;;  %502 = vmatprep.mubr.msk.f32.mxu0 %vm585_vm0, %v584_v5  ;;  %527 = vmatprep.mubr.msk.f32.mxu1 %vm585_vm0, %v584_v5  ;;  %vm122_vm2 = vcmask 269312   ;;  %s586_s12 = smov [#allocation2]  }
   0x6   :  { %58 = vperm.xlu1 %560, %v26_v4   ;;  %v29_v11 = vld [vmem:[%s744_s2] sm:$0xff]  ;;  %v35_v44 = vld [vmem:[%s745_s3 + $0x8] sm:$0xff]  ;;  %v36_v45 = vld [vmem:[%s745_s3 + $0x10] sm:$0xff]  ;;  %s443_s13 = sshll.u32 %s586_s12, 4  ;;  %s444_s13 = int_to_ptr.vmem [resolvable:$true] %s443_s13 }
   0x7   :  { %63 = vperm.xlu0 %559, %v27_v3   ;;  %v451_v12 = vld [vmem:[%s742_s0] ss:$0 sm:$0xff]  ;;  %v37_v46 = vld [vmem:[%s745_s3 + $0x18] sm:$0xff]  ;;  %s561_s14 = scalar_lea.vmem %s444_s13, 16  ;;  %s565_s15 = scalar_lea.vmem %s444_s13, 32 }
   0x8   :  { %v34_v43 = vld [vmem:[%s745_s3] sm:$0xff]  ;;  %p562_p0 = scmp.ne.s32.totalorder %s444_s13, %s561_s14  ;;  %p566_p1 = scmp.lt.s32.totalorder %s444_s13, %s444_s13 }
   0x9   :  { %v38_v47 = vld [vmem:[%s745_s3 + $0x20] sm:$0x1]  ;;  %p567_p2 = scmp.lt.s32.totalorder %s565_s15, %s561_s14 }
   0xa   :  { %53 = vperm.xlu1 %560, %v25_v7   ;;  %v39_v4 = vld [vmem:[%s746_s4] sm:$0xff]  ;;  %v41_v7 = vld [vmem:[%s746_s4 + $0x10] sm:$0xff] }
   0xb   :  { %99 = vperm.xlu0 %559, %v32_v6   ;;  %v40_v6 = vld [vmem:[%s746_s4 + $0x8] sm:$0xff]  ;;  %p568_p3 = por %p567_p2, %p566_p1 }
   0xd   :  { %p569_p4 = pnand %p568_p3, %p562_p0 }
   0xe   :  { %48 = vperm.xlu1 %560, %v24_v9   ;;  %v43_v9 = vld [vmem:[%s746_s4 + $0x20] sm:$0x1] }
   0xf   :  { %94 = vperm.xlu0 %559, %v31_v8   ;;  %v42_v8 = vld [vmem:[%s746_s4 + $0x18] sm:$0xff] }
  0x12   :  { %84 = vperm.xlu1 %560, %v29_v11  }
  0x13   :  { %89 = vperm.xlu0 %559, %v30_v10  }
  0x7d   :  { %v105_v13 = vpop.permute.xlu1 %104 }
  0x7e   :  { %v69_v14 = vpop.permute.xlu0 %68 }
  0x7f   :  { %v81_v15 = vmul.f32 %v451_v12, %v69_v14 }
  0x81   :  { %v111_v16 = vadd.f32 %v105_v13, %v81_v15  ;;  %v59_v18 = vpop.permute.xlu1 %58 }
  0x82   :  { %v64_v17 = vpop.permute.xlu0 %63  ;;  %v79_v25 = vmul.f32 %v451_v12, %v59_v18 }
  0x83   :  { %v116_v19 = vmul.f32 0.01, %v111_v16  ;;  %v80_v20 = vmul.f32 %v451_v12, %v64_v17 }
  0x85   :  { %v121_v21 = vmax.f32 %v111_v16, %v116_v19  ;;  %v54_v23 = vpop.permute.xlu1 %53 }
  0x86   :  { %v100_v22 = vpop.permute.xlu0 %99  ;;  %v78_v31 = vmul.f32 %v451_v12, %v54_v23 }
  0x87   :  { %v110_v24 = vadd.f32 %v100_v22, %v80_v20  ;;  %493 = vmatpush3.msk.msra.mxu0 %vm138_vm1, %v121_v21 }
  0x88   :  { %494 = vmatprep.subr.mxu0 %v584_v5 }
  0x89   :  { %v115_v26 = vmul.f32 0.01, %v110_v24  ;;  %v49_v28 = vpop.permute.xlu1 %48 }
  0x8a   :  { %v95_v27 = vpop.permute.xlu0 %94  ;;  %v77_v33 = vmul.f32 %v451_v12, %v49_v28 }
  0x8b   :  { %v120_v29 = vmax.f32 %v110_v24, %v115_v26  ;;  %v109_v30 = vadd.f32 %v95_v27, %v79_v25 }
  0x8d   :  { %v114_v32 = vmul.f32 0.01, %v109_v30  ;;  %495 = vmatpush3.msra.mxu0 %v120_v29  ;;  %v85_v35 = vpop.permute.xlu1 %84 }
  0x8e   :  { %v90_v34 = vpop.permute.xlu0 %89  ;;  %496 = vmatprep.subr.mxu0 %v584_v5  ;;  %v107_v38 = vadd.f32 %v85_v35, %v77_v33 }
  0x8f   :  { %v119_v36 = vmax.f32 %v109_v30, %v114_v32  ;;  %v108_v37 = vadd.f32 %v90_v34, %v78_v31  ;;  %v44_v30 = vld [vmem:[%s747_s5] sm:$0x1] }
  0x90   :  { %v112_v40 = vmul.f32 0.01, %v107_v38 }
  0x91   :  { %v113_v39 = vmul.f32 0.01, %v108_v37  ;;  %497 = vmatpush3.msra.mxu0 %v119_v36 }
  0x92   :  { %498 = vmatprep.subr.mxu0 %v584_v5  ;;  %v117_v42 = vmax.f32 %v107_v38, %v112_v40 }
  0x93   :  { %v118_v41 = vmax.f32 %v108_v37, %v113_v39 }
  0x95   :  { %499 = vmatpush3.msra.mxu0 %v118_v41 }
  0x96   :  { %500 = vmatprep.subr.mxu0 %v584_v5 }
  0x97   :  { %501 = vmatpush3.msra.mxu0 %v117_v42 }
  0x98   :  { %503 = vmatmul.mubr.msk.f32.vlgmr.msra.gmra.mxu0 %vm122_vm2, %v34_v43  ;;  %542 = vmatprep.subr.mxu0 %v584_v5 }
  0x99   :  { %505 = vmatprep.mubr.msk.f32.mxu0 %vm585_vm0, %v584_v5 }
  0x9c   :  { %506 = vmatmul.mubr.msk.f32.gmra.mxu0 %vm122_vm2, %v35_v44 }
  0x9d   :  { %508 = vmatprep.mubr.msk.f32.mxu0 %vm585_vm0, %v584_v5 }
  0xa0   :  { %509 = vmatmul.mubr.msk.f32.gmra.mxu0 %vm122_vm2, %v36_v45 }
  0xa1   :  { %511 = vmatprep.mubr.msk.f32.mxu0 %vm585_vm0, %v584_v5 }
  0xa4   :  { %512 = vmatmul.mubr.msk.f32.gmra.mxu0 %vm122_vm2, %v37_v46 }
  0xa5   :  { %514 = vmatprep.mubr.msk.f32.mxu0 %vm585_vm0, %v584_v5 }
  0xa8   :  { %515 = vmatmul.mubr.msk.f32.gmra.mxu0 %vm122_vm2, %v38_v47 }
  0xa9   :  { %552 = vmatprep.mubr.msk.f32.mxu0 %vm585_vm0, %v584_v5 }
 0x158   :  { %v208_v48 = vpop.f32.mrf.mxu0 }
 0x159   :  { %v232_v0 = vmul.f32 0.01, %v208_v48 }
 0x15a   :  { %v504_v49 = vpop.f32.mrf.mxu0 }
 0x15b   :  { %v237_v3 = vmax.f32 %v208_v48, %v232_v0 }
 0x15c   :  { %v213_v50 = vpop.f32.mrf.mxu0 }
 0x15d   :  { %v233_v62 = vmul.f32 0.01, %v213_v50 }
 0x15e   :  { %v507_v51 = vpop.f32.mrf.mxu0 }
 0x15f   :  { %v238_v2 = vmax.f32 %v213_v50, %v233_v62 }
 0x160   :  { %v218_v52 = vpop.f32.mrf.mxu0 }
 0x161   :  { %v234_v60 = vmul.f32 0.01, %v218_v52 }
 0x162   :  { %v510_v53 = vpop.f32.mrf.mxu0 }
 0x163   :  { %v239_v1 = vmax.f32 %v218_v52, %v234_v60 }
 0x164   :  { %v223_v54 = vpop.f32.mrf.mxu0 }
 0x165   :  { %v235_v57 = vmul.f32 0.01, %v223_v54 }
 0x166   :  { %v513_v55 = vpop.f32.mrf.mxu0 }
 0x167   :  { %v240_v63 = vmax.f32 %v223_v54, %v235_v57 }
 0x168   :  { %v228_v56 = vpop.f32.mrf.mxu0 }
 0x169   :  { %v236_v58 = vmul.f32 0.01, %v228_v56 }
 0x16a   :  { %v516_v59 = vpop.f32.mrf.mxu0 }
 0x16b   :  { %v241_v61 = vmax.f32 %v228_v56, %v236_v58 }
 0x16d   :  { %518 = vmatpush3.msk.msra.mxu1 %vm138_vm1, %v241_v61 }
 0x16e   :  { %519 = vmatprep.subr.mxu1 %v584_v5 }
 0x16f   :  { %520 = vmatpush3.msra.mxu1 %v240_v63 }
 0x170   :  { %521 = vmatprep.subr.mxu1 %v584_v5 }
 0x171   :  { %522 = vmatpush3.msra.mxu1 %v239_v1 }
 0x172   :  { %523 = vmatprep.subr.mxu1 %v584_v5 }
 0x173   :  { %524 = vmatpush3.msra.mxu1 %v238_v2 }
 0x174   :  { %525 = vmatprep.subr.mxu1 %v584_v5 }
 0x175   :  { %526 = vmatpush3.msra.mxu1 %v237_v3 }
 0x176   :  { %528 = vmatmul.mubr.msk.f32.vlgmr.msra.gmra.mxu1 %vm122_vm2, %v39_v4 }
 0x177   :  { %530 = vmatprep.mubr.msk.f32.mxu1 %vm585_vm0, %v584_v5 }
 0x17a   :  { %531 = vmatmul.mubr.msk.f32.gmra.mxu1 %vm122_vm2, %v40_v6 }
 0x17b   :  { %533 = vmatprep.mubr.msk.f32.mxu1 %vm585_vm0, %v584_v5 }
 0x17e   :  { %534 = vmatmul.mubr.msk.f32.gmra.mxu1 %vm122_vm2, %v41_v7 }
 0x17f   :  { %536 = vmatprep.mubr.msk.f32.mxu1 %vm585_vm0, %v584_v5 }
 0x182   :  { %537 = vmatmul.mubr.msk.f32.gmra.mxu1 %vm122_vm2, %v42_v8 }
 0x183   :  { %539 = vmatprep.mubr.msk.f32.mxu1 %vm585_vm0, %v584_v5 }
 0x186   :  { %540 = vmatmul.mubr.msk.f32.gmra.mxu1 %vm122_vm2, %v43_v9 }
 0x236   :  { %v326_v10 = vpop.f32.mrf.mxu1 }
 0x237   :  { %v350_v26 = vmul.f32 0.01, %v326_v10 }
 0x238   :  { %v529_v11 = vpop.f32.mrf.mxu1 }
 0x239   :  { %v355_v29 = vmax.f32 %v326_v10, %v350_v26 }
 0x23a   :  { %v331_v12 = vpop.f32.mrf.mxu1 }
 0x23b   :  { %v351_v24 = vmul.f32 0.01, %v331_v12 }
 0x23c   :  { %v532_v13 = vpop.f32.mrf.mxu1 }
 0x23d   :  { %v356_v28 = vmax.f32 %v331_v12, %v351_v24 }
 0x23e   :  { %v336_v14 = vpop.f32.mrf.mxu1 }
 0x23f   :  { %v352_v22 = vmul.f32 0.01, %v336_v14 }
 0x240   :  { %v535_v15 = vpop.f32.mrf.mxu1 }
 0x241   :  { %v357_v27 = vmax.f32 %v336_v14, %v352_v22 }
 0x242   :  { %v341_v16 = vpop.f32.mrf.mxu1 }
 0x243   :  { %v353_v19 = vmul.f32 0.01, %v341_v16 }
 0x244   :  { %v538_v17 = vpop.f32.mrf.mxu1 }
 0x245   :  { %v358_v25 = vmax.f32 %v341_v16, %v353_v19 }
 0x246   :  { %v346_v18 = vpop.f32.mrf.mxu1 }
 0x247   :  { %v354_v20 = vmul.f32 0.01, %v346_v18 }
 0x248   :  { %v541_v21 = vpop.f32.mrf.mxu1 }
 0x249   :  { %v359_v23 = vmax.f32 %v346_v18, %v354_v20 }
 0x24b   :  { %543 = vmatpush3.msk.msra.mxu0 %vm138_vm1, %v359_v23 }
 0x24c   :  { %544 = vmatprep.subr.mxu0 %v584_v5 }
 0x24d   :  { %545 = vmatpush3.msra.mxu0 %v358_v25 }
 0x24e   :  { %546 = vmatprep.subr.mxu0 %v584_v5 }
 0x24f   :  { %547 = vmatpush3.msra.mxu0 %v357_v27 }
 0x250   :  { %548 = vmatprep.subr.mxu0 %v584_v5 }
 0x251   :  { %549 = vmatpush3.msra.mxu0 %v356_v28 }
 0x252   :  { %550 = vmatprep.subr.mxu0 %v584_v5 }
 0x253   :  { %551 = vmatpush3.msra.mxu0 %v355_v29 }
 0x254   :  { %553 = vmatmul.mubr.msk.f32.vlgmr.msra.gmra.mxu0 %vm122_vm2, %v44_v30 }
 0x314   :  { %v432_v31 = vpop.f32.mrf.mxu0 }
 0x315   :  { %436 = vst [vmem:[#allocation2] sm:$0x1] %v432_v31 }
 0x316   :  { %v554_v32 = vpop.f32.mrf.mxu0 }
 0x317   :  { %572 = shalt.err (!%p569_p4)
}
 0x318   :  { %446 = dma.vmem_to_hbm [thread:$0]  %s444_s13, 16, %s748_s6, [#allocation3]  }
 0x319   :  { %581 = dma.done.wait [#allocation3], 16  }
 0x31a   :  { %582 = vsyncadd [#allocation3], 4294967280 }
 0x31b   :  { %450 = vsyncpa [#allocation3], 1 }

</bundles_post_ra>
